<compile_context>
chip_gen: v7x
topology: tpu7x:2x2x1
jax: 0.10.0
libtpu: 0.0.40
codegen_flags: <defaults>
</compile_context>

<pallas_src>
import functools
import math

import jax
import jax.numpy as jnp
from jax.experimental import pallas as pl
from jax.experimental.pallas import tpu as pltpu


def _round_up(x, m):
    return ((x + m - 1) // m) * m


def _scaled_dot_attn_kernel(lens_ref, q_ref, w_ref, b_ref, keys_ref,
                            ctx_ref, energy_ref, *, scale, keys_transposed):
    # Native-dtype tiles; the MXU accumulates in f32 via preferred_element_type.
    q = q_ref[...]                              # (tb, Dq)
    w = w_ref[...]                              # (Dq, K)   resident
    bias = b_ref[...].astype(jnp.float32)       # (1, K)    resident
    keys = keys_ref[...]                        # (tb, T, K) or (tb, K, T)
    lens = lens_ref[...]                        # (tb, 1) int32

    # Fused query_transform on the MXU, with the 1/sqrt(Dq) scale folded into
    # the small (tb, K) result rather than the (tb, T) scores.
    qk = (jnp.dot(q, w, preferred_element_type=jnp.float32) + bias) \
         * jnp.float32(scale)                                        # (tb, K) f32

    # Keep keys in native dtype: cast the tiny lhs down instead, so the big
    # contraction is a mixed-precision MXU batched matmul (no f32 keys copy).
    lhs = qk if keys.dtype == jnp.float32 else qk.astype(keys.dtype)
    lhs3 = lhs[:, None, :]                                           # (tb, 1, K)
    if keys_transposed:
        # keys: (tb, K, T) — T on lanes.
        scores = jnp.einsum('bqk,bkt->bqt', lhs3, keys,
                            preferred_element_type=jnp.float32)[:, 0, :]
    else:
        # keys: (tb, T, K) — K on lanes.
        scores = jnp.einsum('bqk,btk->bqt', lhs3, keys,
                            preferred_element_type=jnp.float32)[:, 0, :]

    # In-kernel length masking (t >= input_lens -> -inf) + stable softmax.
    # NOTE: rows with input_lens == 0 produce NaN, matching the PyTorch ref.
    t_idx = jax.lax.broadcasted_iota(jnp.int32, scores.shape, 1)     # (tb, T)
    scores = jnp.where(t_idx < lens, scores, -jnp.inf)
    m = jnp.max(scores, axis=1, keepdims=True)
    e = jnp.exp(scores - m)
    probs = e * pl.reciprocal(jnp.sum(e, axis=1, keepdims=True), approx=True)

    p = probs if keys.dtype == jnp.float32 else probs.astype(keys.dtype)
    p3 = p[:, None, :]                                               # (tb, 1, T)
    if keys_transposed:
        ctx = jnp.einsum('bqt,bkt->bqk', p3, keys,
                         preferred_element_type=jnp.float32)[:, 0, :]
    else:
        ctx = jnp.einsum('bqt,btk->bqk', p3, keys,
                         preferred_element_type=jnp.float32)[:, 0, :]

    ctx_ref[...] = ctx.astype(ctx_ref.dtype)
    energy_ref[...] = probs.astype(energy_ref.dtype)


def scaled_dot_attention(query, keys, weight, bias, input_lens, *,
                         block_b=512, vmem_limit_bytes=None):
    """Pallas equivalent of Attention.forward with att_type='scaled_dot'.

    query:      (B, Dq)   float
    keys:       (B, T, K) float
    weight:     (Dq, K)   float  (query_transform weight, input-major)
    bias:       (K,)      float
    input_lens: (B,)      int    (valid key length per batch row)
    Returns (context (B, K), energy (B, 1, T)).
    """
    B, Dq = query.shape
    Bk, T, K = keys.shape
    assert Bk == B, (Bk, B)
    scale = 1.0 / math.sqrt(Dq)

    # ---- generation-aware VMEM budget (v7x: 64 MiB/TC, v5e/v6e: 128 MiB) ----
    try:
        vmem_cap = int(pltpu.get_tpu_info().vmem_capacity_bytes)
    except Exception:
        vmem_cap = 64 * 1024 * 1024                  # conservative (v7x-sized)
    if vmem_limit_bytes is None:
        vmem_limit_bytes = (vmem_cap * 5) // 8       # 40 MiB v7x / 80 MiB v5e,v6e
    keys_budget = vmem_cap // 4                      # double-buffered keys tiles

    # ---- keys layout: put the longer of (T, K) on the lane axis -------------
    keys_itemsize = jnp.dtype(keys.dtype).itemsize
    sub_pack_keys = max(8, 32 // keys_itemsize)      # sublane packing of keys dtype
    tk_row = _round_up(T, sub_pack_keys) * _round_up(K, 128) * keys_itemsize
    kt_row = _round_up(K, sub_pack_keys) * _round_up(T, 128) * keys_itemsize
    keys_transposed = kt_row < tk_row
    if keys_transposed:
        # TODO(synk): produce keys in (B, K, T) layout upstream to avoid this
        # extra HBM pass when K << 128 and T is long.
        keys_in = jnp.swapaxes(keys, 1, 2)           # (B, K, T)
        keys_row_bytes = kt_row
        keys_block = (None, K, T)
    else:
        keys_in = keys
        keys_row_bytes = tk_row
        keys_block = (None, T, K)

    # ---- batch tile ----------------------------------------------------------
    min_itemsize = min(jnp.dtype(query.dtype).itemsize, keys_itemsize)
    pack = max(8, 32 // min_itemsize)                # sublane packing for 2-D tiles
    t_pad = _round_up(T, 128)
    k_pad = _round_up(K, 128)
    d_pad = _round_up(Dq, 128)
    # Per-row working set: double-buffered keys tile plus a handful of f32
    # (tb, T)/(tb, K)/(tb, Dq) intermediates (scores/exp/probs, qk/ctx, outputs).
    row_bytes = 2 * keys_row_bytes + 4 * (8 * t_pad + 6 * k_pad + 2 * d_pad)
    max_tb = max(pack, keys_budget // max(1, row_bytes))
    tb = min(block_b, B, max_tb)
    # Force >= 2 grid steps when B permits, so 'parallel' actually shards the
    # grid across both v7x TensorCores and the pipeline has ramp iterations.
    if B >= 2 * pack:
        tb = min(tb, _round_up(pl.cdiv(B, 2), pack))
    if tb < B:
        tb = max(pack, (tb // pack) * pack)          # sublane alignment
    tb = min(tb, B)
    grid = (pl.cdiv(B, tb),)
    # Ragged last tile: OOB rows may compute NaN internally but are never
    # written back (rows are fully independent) — keep it that way.
    # TODO(synk): for very long T (keys row no longer fits the budget) add a
    # second 'arbitrary' grid axis over T with flash-style online-softmax.
    keys_block = (tb,) + keys_block[1:]

    lens2 = input_lens.astype(jnp.int32).reshape(B, 1)
    bias2 = bias.reshape(1, K)

    kernel = functools.partial(_scaled_dot_attn_kernel, scale=scale,
                               keys_transposed=keys_transposed)

    ctx, energy = pl.pallas_call(
        kernel,
        out_shape=(jax.ShapeDtypeStruct((B, K), query.dtype),
                   jax.ShapeDtypeStruct((B, T), jnp.float32)),
        grid_spec=pltpu.PrefetchScalarGridSpec(
            num_scalar_prefetch=0,
            grid=grid,
            in_specs=[
                pl.BlockSpec((tb, 1), lambda i: (i, 0)),       # input_lens
                pl.BlockSpec((tb, Dq), lambda i: (i, 0)),      # query
                pl.BlockSpec((Dq, K), lambda i: (0, 0)),       # weight (resident)
                pl.BlockSpec((1, K), lambda i: (0, 0)),        # bias   (resident)
                pl.BlockSpec(keys_block, lambda i: (i, 0, 0)),  # keys
            ],
            out_specs=[
                pl.BlockSpec((tb, K), lambda i: (i, 0)),       # context
                pl.BlockSpec((tb, T), lambda i: (i, 0)),       # energy (probs)
            ],
        ),
        compiler_params=pltpu.CompilerParams(
            dimension_semantics=("parallel",),                 # megacore on v7x
            vmem_limit_bytes=vmem_limit_bytes),
    )(lens2, query, weight, bias2, keys_in)

    # PyTorch returns energy shaped (B, 1, T).
    return ctx, energy.reshape(B, 1, T)

# TODO(synk): arbitrary (non-prefix) external masks (the `mask` argument used
# when input_lens is None) and the broken 'dot' branch are not implemented.


def _reference(query, keys, weight, bias, input_lens):
    """Pure-JAX reference of the PyTorch scaled_dot semantics."""
    B, Dq = query.shape
    _, T, K = keys.shape
    scale = 1.0 / math.sqrt(Dq)
    q = query @ weight + bias                                    # (B, K)
    scores = jnp.einsum('bk,btk->bt', q, keys) * scale           # (B, T)
    valid = jnp.arange(T)[None, :] < input_lens[:, None]
    scores = jnp.where(valid, scores, -jnp.inf)
    probs = jax.nn.softmax(scores, axis=-1)
    ctx = jnp.einsum('bt,btk->bk', probs, keys)                  # (B, K)
    return ctx, probs.reshape(B, 1, T)


if __name__ == "__main__":
    key = jax.random.PRNGKey(0)
    k1, k2, k3, k4 = jax.random.split(key, 4)

    B, T = 2, 8
    query_dim, key_dim = 32, 16

    query = jax.random.normal(k1, (B, query_dim), jnp.float32)
    keys = jax.random.normal(k2, (B, T, key_dim), jnp.float32)
    # query_transform parameters (stored as (Dq, K) so the kernel does q @ W + b).
    weight = jax.random.normal(k3, (query_dim, key_dim), jnp.float32) / math.sqrt(query_dim)
    bias = jax.random.normal(k4, (key_dim,), jnp.float32) * 0.1
    input_lens = jnp.array([5, 8], jnp.int32)

    ctx, energy = scaled_dot_attention(query, keys, weight, bias, input_lens)
    ctx = jax.block_until_ready(ctx)
    energy = jax.block_until_ready(energy)

    ref_ctx, ref_energy = _reference(query, keys, weight, bias, input_lens)
    assert ctx.shape == (B, key_dim) and energy.shape == (B, 1, T)
    # Tolerance is relaxed because the softmax normalizer uses the EUP
    # approximate reciprocal (pl.reciprocal(approx=True)).
    assert jnp.allclose(ctx, ref_ctx, rtol=1e-2, atol=1e-2), (ctx, ref_ctx)
    assert jnp.allclose(energy, ref_energy, rtol=1e-2, atol=1e-2), (energy, ref_energy)

    print("KERNEL_OK")
</pallas_src>

<mosaic_0001>
module attributes {stable_mosaic.version = 11 : i64} {
  func.func @_scaled_dot_attn_kernel(%arg0: i32, %arg1: memref<2x1xi32, #tpu.memory_space<vmem>>, %arg2: memref<2x32xf32, #tpu.memory_space<vmem>>, %arg3: memref<32x16xf32, #tpu.memory_space<vmem>>, %arg4: memref<1x16xf32, #tpu.memory_space<vmem>>, %arg5: memref<2x8x16xf32, #tpu.memory_space<vmem>>, %arg6: memref<2x16xf32, #tpu.memory_space<vmem>>, %arg7: memref<2x8xf32, #tpu.memory_space<vmem>>) attributes {dimension_semantics = [#tpu.dimension_semantics<parallel>], iteration_bounds = array<i64: 1>, scalar_prefetch = 0 : i64, scratch_operands = 0 : i64, tpu.core_type = #tpu.core_type<tc>, window_params = [{transform_indices = @transform_0, window_bounds = array<i64: 2, 1>}, {transform_indices = @transform_1, window_bounds = array<i64: 2, 32>}, {pipeline_mode = #tpu.pipeline_mode<synchronous>, transform_indices = @transform_2, window_bounds = array<i64: 32, 16>}, {pipeline_mode = #tpu.pipeline_mode<synchronous>, transform_indices = @transform_3, window_bounds = array<i64: 1, 16>}, {transform_indices = @transform_4, window_bounds = array<i64: 2, 8, 16>}, {transform_indices = @transform_5, window_bounds = array<i64: 2, 16>}, {transform_indices = @transform_6, window_bounds = array<i64: 2, 8>}]} {
    %c0 = arith.constant 0 : index
    %c0_0 = arith.constant 0 : index
    %0 = vector.load %arg2[%c0, %c0_0] : memref<2x32xf32, #tpu.memory_space<vmem>>, vector<2x32xf32>
    %c0_1 = arith.constant 0 : index
    %c0_2 = arith.constant 0 : index
    %1 = vector.load %arg3[%c0_1, %c0_2] : memref<32x16xf32, #tpu.memory_space<vmem>>, vector<32x16xf32>
    %c0_3 = arith.constant 0 : index
    %c0_4 = arith.constant 0 : index
    %2 = vector.load %arg4[%c0_3, %c0_4] : memref<1x16xf32, #tpu.memory_space<vmem>>, vector<1x16xf32>
    %c0_5 = arith.constant 0 : index
    %c0_6 = arith.constant 0 : index
    %c0_7 = arith.constant 0 : index
    %3 = vector.load %arg5[%c0_5, %c0_6, %c0_7] : memref<2x8x16xf32, #tpu.memory_space<vmem>>, vector<2x8x16xf32>
    %c0_8 = arith.constant 0 : index
    %c0_9 = arith.constant 0 : index
    %4 = vector.load %arg1[%c0_8, %c0_9] : memref<2x1xi32, #tpu.memory_space<vmem>>, vector<2x1xi32>
    %cst = arith.constant dense<0.000000e+00> : vector<2x16xf32>
    %5 = tpu.matmul %0, %1, %cst {dimension_numbers = #tpu.dot_dimension_numbers<[1], [0], [0], [1], [0, 0, 1, 1], [], []>} : vector<2x32xf32>, vector<32x16xf32>, vector<2x16xf32> -> vector<2x16xf32>
    %6 = vector.broadcast %2 : vector<1x16xf32> to vector<2x16xf32>
    %7 = arith.addf %5, %6 : vector<2x16xf32>
    %cst_10 = arith.constant 0.176776692 : f32
    %8 = vector.broadcast %cst_10 : f32 to vector<2x16xf32>
    %9 = arith.mulf %7, %8 : vector<2x16xf32>
    %10 = vector.shape_cast %9 : vector<2x16xf32> to vector<2x1x16xf32>
    "tpu.trace_start"() <{level = 10 : i32, message = "bqk,btk->bqt"}> : () -> ()
    %cst_11 = arith.constant dense<0.000000e+00> : vector<2x1x8xf32>
    %11 = tpu.matmul %10, %3, %cst_11 {dimension_numbers = #tpu.dot_dimension_numbers<[2], [2], [1], [1], [0, 0, 0, 1, 1, 1], [0], [0]>} : vector<2x1x16xf32>, vector<2x8x16xf32>, vector<2x1x8xf32> -> vector<2x1x8xf32>
    "tpu.trace_stop"() : () -> ()
    %12 = vector.shape_cast %11 : vector<2x1x8xf32> to vector<2x8xf32>
    %13 = tpu.iota {dimensions = array<i32: 1>} : vector<2x8xi32>
    %14 = vector.broadcast %4 : vector<2x1xi32> to vector<2x8xi32>
    %15 = arith.cmpi slt, %13, %14 : vector<2x8xi32>
    %cst_12 = arith.constant 0xFF800000 : f32
    %16 = vector.broadcast %cst_12 : f32 to vector<2x8xf32>
    %17 = arith.select %15, %12, %16 : vector<2x8xi1>, vector<2x8xf32>
    %cst_13 = arith.constant dense<0xFF800000> : vector<2xf32>
    %18 = vector.multi_reduction <maximumf>, %17, %cst_13 [1] : vector<2x8xf32> to vector<2xf32>
    %19 = vector.shape_cast %18 : vector<2xf32> to vector<2x1xf32>
    %20 = vector.broadcast %19 : vector<2x1xf32> to vector<2x8xf32>
    %21 = arith.subf %17, %20 : vector<2x8xf32>
    %22 = math.exp %21 : vector<2x8xf32>
    %cst_14 = arith.constant dense<0.000000e+00> : vector<2xf32>
    %23 = vector.multi_reduction <add>, %22, %cst_14 [1] : vector<2x8xf32> to vector<2xf32>
    %24 = vector.shape_cast %23 : vector<2xf32> to vector<2x1xf32>
    %25 = tpu.reciprocal %24 {approx = true} : vector<2x1xf32> -> vector<2x1xf32>
    %26 = vector.broadcast %25 : vector<2x1xf32> to vector<2x8xf32>
    %27 = arith.mulf %22, %26 : vector<2x8xf32>
    %28 = vector.shape_cast %27 : vector<2x8xf32> to vector<2x1x8xf32>
    "tpu.trace_start"() <{level = 10 : i32, message = "bqt,btk->bqk"}> : () -> ()
    %cst_15 = arith.constant dense<0.000000e+00> : vector<2x1x16xf32>
    %29 = tpu.matmul %28, %3, %cst_15 {dimension_numbers = #tpu.dot_dimension_numbers<[2], [1], [1], [2], [0, 0, 0, 1, 1, 2], [0], [0]>} : vector<2x1x8xf32>, vector<2x8x16xf32>, vector<2x1x16xf32> -> vector<2x1x16xf32>
    "tpu.trace_stop"() : () -> ()
    %30 = vector.shape_cast %29 : vector<2x1x16xf32> to vector<2x16xf32>
    %c0_16 = arith.constant 0 : index
    %c0_17 = arith.constant 0 : index
    %31 = vector.load %arg6[%c0_16, %c0_17] : memref<2x16xf32, #tpu.memory_space<vmem>>, vector<2x16xf32>
    tpu.vector_store %arg6[%c0_16, %c0_17], %30 {strides = array<i32>} : memref<2x16xf32, #tpu.memory_space<vmem>>, vector<2x16xf32>,
    %c0_18 = arith.constant 0 : index
    %c0_19 = arith.constant 0 : index
    %32 = vector.load %arg7[%c0_18, %c0_19] : memref<2x8xf32, #tpu.memory_space<vmem>>, vector<2x8xf32>
    tpu.vector_store %arg7[%c0_18, %c0_19], %27 {strides = array<i32>} : memref<2x8xf32, #tpu.memory_space<vmem>>, vector<2x8xf32>,
    return
  }
  func.func @transform_0(%arg0: i32) -> (i32, i32) {
    %c0_i32 = arith.constant 0 : i32
    %c0_i32_0 = arith.constant 0 : i32
    return %arg0, %c0_i32 : i32, i32
  }
  func.func @transform_1(%arg0: i32) -> (i32, i32) {
    %c0_i32 = arith.constant 0 : i32
    %c0_i32_0 = arith.constant 0 : i32
    return %arg0, %c0_i32 : i32, i32
  }
  func.func @transform_2(%arg0: i32) -> (i32, i32) {
    %c0_i32 = arith.constant 0 : i32
    %c0_i32_0 = arith.constant 0 : i32
    %c0_i32_1 = arith.constant 0 : i32
    return %c0_i32, %c0_i32_0 : i32, i32
  }
  func.func @transform_3(%arg0: i32) -> (i32, i32) {
    %c0_i32 = arith.constant 0 : i32
    %c0_i32_0 = arith.constant 0 : i32
    %c0_i32_1 = arith.constant 0 : i32
    return %c0_i32, %c0_i32_0 : i32, i32
  }
  func.func @transform_4(%arg0: i32) -> (i32, i32, i32) {
    %c0_i32 = arith.constant 0 : i32
    %c0_i32_0 = arith.constant 0 : i32
    %c0_i32_1 = arith.constant 0 : i32
    return %arg0, %c0_i32, %c0_i32_0 : i32, i32, i32
  }
  func.func @transform_5(%arg0: i32) -> (i32, i32) {
    %c0_i32 = arith.constant 0 : i32
    %c0_i32_0 = arith.constant 0 : i32
    return %arg0, %c0_i32 : i32, i32
  }
  func.func @transform_6(%arg0: i32) -> (i32, i32) {
    %c0_i32 = arith.constant 0 : i32
    %c0_i32_0 = arith.constant 0 : i32
    return %arg0, %c0_i32 : i32, i32
  }
}

</mosaic_0001>

<bundles_post_ra>
// kernel: tpu_custom_call.1
= control target key start
LH: loop header
LB: loop body
LE: loop exit
PB: predicated region body
PF: predicated region fallthrough
CT: control target
= control target key end

     0   :  { %12 = vsyncpa [#allocation3], 0  ;;  %v635_v3 = vmov 0.0|0.0   ;;  %vm636_vm0 = vmmov 0   ;;  %v637_v6 = vmov 0.0   ;;  %s742_s0 = inlined_call_operand.vmem [shape: s32[2,1], index: 0, kind: input, shape index: {}]   ;;  %s743_s1 = inlined_call_operand.vmem [shape: f32[2,32], index: 1, kind: input, shape index: {}]   ;;  %s744_s2 = inlined_call_operand.vmem [shape: f32[32,16], index: 2, kind: input, shape index: {}]   ;;  %s745_s3 = inlined_call_operand.vmem [shape: f32[1,16], index: 3, kind: input, shape index: {}]   ;;  %s746_s4 = inlined_call_operand.vmem [shape: f32[2,8,16], index: 4, kind: input, shape index: {}]   ;;  %s747_s5 = inlined_call_operand.hbm [shape: f32[2,16], index: 5, kind: output, shape index: {0}]   ;;  %s748_s6 = inlined_call_operand.hbm [shape: f32[2,8], index: 6, kind: output, shape index: {1}]  }
   0x1   :  { %v25_v0 = vld [vmem:[%s744_s2] sm:$0xff]  ;;  %v26_v1 = vld [vmem:[%s744_s2 + $0x8] sm:$0xff]  ;;  %v27_v2 = vld [vmem:[%s744_s2 + $0x10] sm:$0xff]  ;;  %569 = vmatprep.subr.bf16.mxu0 %v635_v3  ;;  %546 = vmatprep.mubr.msk.f32.mxu0 %vm636_vm0, %v637_v6 }
   0x2   :  { %v570_v4 = vpack.c.bf16 %v26_v1, %v25_v0  ;;  %v28_v5 = vld [vmem:[%s744_s2 + $0x18] sm:$0xff]  ;;  %549 = vmatprep.subr.mxu1 %v637_v6  ;;  %551 = vmatprep.mubr.msk.f32.mxu1 %vm636_vm0, %v637_v6 }
   0x3   :  { %13 = vsyncpa [#allocation5], 0  ;;  %v573_v7 = vpack.c.bf16 %v28_v5, %v27_v2  ;;  %v24_v8 = vld [vmem:[%s743_s1] sm:$0x3]  ;;  %vm39_vm1 = vcmask 261120   ;;  %vm137_vm2 = vcmask 130048   ;;  %v118_v14 = vlaneseq }
   0x4   :  { %571 = vmatpush3.bf16.msra.mxu0 %v570_v4  ;;  %v30_v9 = vld [vmem:[%s746_s4] sm:$0xff]  ;;  %v638_v11 = vmov 0   ;;  %v639_v12 = vmov 1966171168   ;;  %v31_v26 = vld [vmem:[%s746_s4 + $0x8] sm:$0xff]  ;;  %vm297_vm3 = vcmask 1041409  }
   0x5   :  { %572 = vmatprep.subr.bf16.mxu0 %v635_v3  ;;  %550 = vmatpush3.xpose.msk.msra.mxu1 %vm137_vm2, %v30_v9  ;;  %v32_v10 = vld [vmem:[%s742_s0] sm:$0x3]  ;;  %v116_v13 = vunpack.c.l.s4 %v639_v12  ;;  %v119_v16 = vshrl.u32 %v118_v14, 7  ;;  %v289_v30 = vand.u32 127, %v118_v14  ;;  %vm301_vm5 = vcmask 58368  }
   0x6   :  { %554 = vmatprep.subr.mxu1 %v637_v6  ;;  %582 = vset.pattern.permute.xlu0 %v638_v11  ;;  %v517_v17 = vld [vmem:[%s745_s3] ss:$0 sm:$0xff]  ;;  %vm336_vm6 = vcmask 64512   ;;  %s640_s3 = smov [#allocation4]  }
   0x7   :  { %291 = vperm.xlu0 %582, %v32_v10   ;;  %v117_v15 = vunpack.c.0.s8 %v116_v13  ;;  %s505_s4 = sshll.u32 %s640_s3, 4  ;;  %s506_s4 = int_to_ptr.vmem [resolvable:$true] %s505_s4 }
   0x8   :  { %574 = vmatpush3.bf16.msra.mxu0 %v573_v7  ;;  %s587_s12 = scalar_lea.vmem %s506_s4, 32  ;;  %p592_p1 = scmp.lt.s32.totalorder %s506_s4, %s506_s4 }
   0x9   :  { %559 = vmatprep.subr.mxu0 %v637_v6  ;;  %v120_v20 = vsub.s32 %v117_v15, %v119_v16  ;;  %p588_p0 = scmp.ne.s32.totalorder %s506_s4, %s587_s12  ;;  %p593_p2 = scmp.lt.s32.totalorder %s587_s12, %s587_s12 }
   0xb   :  { %547 = vmatmul.mubr.msk.f32.vlgmr.msra.gmra.mrb[0].mxu0 %vm39_vm1, %v24_v8  ;;  %p594_p3 = por %p593_p2, %p592_p1 }
   0xc   :  { %561 = vmatprep.mubr.msk.f32.mxu0 %vm636_vm0, %v637_v6  ;;  %560 = vmatpush3.msra.mxu0 %v30_v9 }
   0xd   :  { %p595_p4 = pnand %p594_p3, %p588_p0 }
  0x86   :  { %v292_v31 = vpop.permute.xlu0 %291 }
  0x87   :  { %vm293_vm4 = vcmp.lt.s32.totalorder %v289_v30, %v292_v31 }
  0xde   :  { %v109_v18 = vpop.f32.mrb[0].mxu0 }
  0xdf   :  { %v110_v19 = vadd.f32 %v517_v17, %v109_v18  ;;  %v548_v21 = vpop.f32.mrb[1].mxu0 }
  0xe1   :  { %v113_v22 = vmul.f32 0.17677669, %v110_v19 }
  0xe3   :  { %v121_v23 = vrot.slane %v113_v22, %v120_v20 }
  0xe5   :  { %v122_v24 = vcombine.high %v121_v23, %v121_v23  ;;  %v129_v25 = vrot.slane %v121_v23, %v120_v20 }
  0xe7   :  { %552 = vmatmul.mubr.msk.f32.vlgmr.msra.gmra.mrb[0].mxu1 %vm137_vm2, %v129_v25  ;;  %v136_v27 = vrot.slane %v122_v24, %v120_v20 }
  0xe8   :  { %555 = vmatpush3.xpose.msk.msra.mxu1 %vm137_vm2, %v31_v26  ;;  %556 = vmatprep.mubr.msk.f32.mxu1 %vm636_vm0, %v637_v6 }
  0xe9   :  { %564 = vmatprep.subr.mxu1 %v637_v6 }
  0xeb   :  { %557 = vmatmul.mubr.msk.f32.vlgmr.msra.gmra.mrb[2].mxu1 %vm137_vm2, %v136_v27 }
  0xec   :  { %565 = vmatpush3.msra.mxu1 %v31_v26  ;;  %566 = vmatprep.mubr.msk.f32.mxu1 %vm636_vm0, %v637_v6 }
 0x1ba   :  { %v209_v28 = vpop.f32.mrb[0].mxu1 }
 0x1bb   :  { %v553_v29 = vpop.f32.mrb[1].mxu1 }
 0x1be   :  { %v284_v32 = vpop.f32.mrb[2].mxu1 }
 0x1bf   :  { %v296_v33 = vrot.slane %v284_v32, 7  ;;  %v558_v34 = vpop.f32.mrb[3].mxu1 }
 0x1c1   :  { %v298_v35 = vsel %vm297_vm3, %v296_v33, %v209_v28 }
 0x1c2   :  { %v300_v36 = vsel %vm293_vm4, %v298_v35, -inf }
 0x1c3   :  { %v302_v37 = vsel %vm301_vm5, %v300_v36, -inf }
 0x1c4   :  { %303 = vmax.xlane.f32.xlu0 %v302_v37 }
 0x251   :  { %v304_v38 = vpop.xlane.xlu0 %303 }
 0x252   :  { %v305_v39 = vsub.f32 %v300_v36, %v304_v38 }
 0x254   :  { %v306_v40 = vmul.f32 1.442695, %v305_v39 }
 0x256   :  { %583 = vpow2.f32 %v306_v40 }
 0x260   :  { %v584_v41 = vpop.eup %583 }
 0x261   :  { %v308_v42 = vsel %vm301_vm5, %v584_v41, 0.0 }
 0x262   :  { %309 = vadd.xlane.f32.xlu1 %v308_v42 }
 0x2ef   :  { %v310_v43 = vpop.xlane.xlu1 %309 }
 0x2f0   :  { %585 = vrcp.f32 %v310_v43 }
 0x2fa   :  { %v586_v44 = vpop.eup %585 }
 0x2fb   :  { %v312_v45 = vmul.f32 %v586_v44, %v584_v41 }
 0x2fd   :  { %v320_v46 = vrot.slane %v312_v45, %v120_v20  ;;  %488 = vst.msk [vmem:[#allocation4] sm:$0x3] %vm301_vm5, %v312_v45 }
 0x2ff   :  { %v328_v47 = vrot.slane %v320_v46, %v120_v20  ;;  %v321_v48 = vcombine.high %v320_v46, %v320_v46 }
 0x301   :  { %562 = vmatmul.mubr.msk.f32.vlgmr.msra.gmra.mrb[2].mxu0 %vm336_vm6, %v328_v47  ;;  %v335_v49 = vrot.slane %v321_v48, %v120_v20 }
 0x303   :  { %567 = vmatmul.mubr.msk.f32.vlgmr.msra.gmra.mrb[4].mxu1 %vm336_vm6, %v335_v49 }
 0x304   :  { %598 = shalt.err (!%p595_p4)
}
 0x305   :  { %s599_s15 = scalar_lea.hbm %s748_s6, 32 }
 0x306   :  { %p600_p5 = scmp.ne.s32.totalorder %s748_s6, %s599_s15  ;;  %p603_p6 = scmp.lt.u32.totalorder %s599_s15, %s748_s6 }
 0x308   :  { %p605_p7 = pnand %p603_p6, %p600_p5 }
 0x30a   :  { %608 = shalt.err (!%p605_p7)
}
 0x30b   :  { %508 = dma.vmem_to_hbm [thread:$0]  %s506_s4, 32, %s748_s6, [#allocation5]   ;;  %vm486_vm7 = vcmask 123904  }
 0x30c   :  { %s641_s22 = smov [#allocation2]  }
 0x30d   :  { %s495_s23 = sshll.u32 %s641_s22, 4  ;;  %s496_s23 = int_to_ptr.vmem [resolvable:$true] %s495_s23 }
 0x30e   :  { %s609_s24 = scalar_lea.vmem %s496_s23, 32  ;;  %p614_p9 = scmp.lt.s32.totalorder %s496_s23, %s496_s23 }
 0x30f   :  { %p610_p8 = scmp.ne.s32.totalorder %s496_s23, %s609_s24  ;;  %p615_p10 = scmp.lt.s32.totalorder %s609_s24, %s609_s24 }
 0x311   :  { %p616_p11 = por %p615_p10, %p614_p9 }
 0x313   :  { %p617_p12 = pnand %p616_p11, %p610_p8 }
 0x3d4   :  { %v405_v50 = vpop.f32.mrb[2].mxu0 }
 0x3d5   :  { %v563_v51 = vpop.f32.mrb[3].mxu0 }
 0x3d6   :  { %v477_v52 = vpop.f32.mrb[4].mxu1 }
 0x3d7   :  { %v483_v53 = vrot.slane %v477_v52, 7  ;;  %v568_v54 = vpop.f32.mrb[5].mxu1 }
 0x3d9   :  { %v484_v55 = vsel %vm297_vm3, %v483_v53, %v405_v50 }
 0x3da   :  { %487 = vst.msk [vmem:[#allocation2] sm:$0x3] %vm486_vm7, %v484_v55 }
 0x3db   :  { %620 = shalt.err (!%p617_p12)
}
 0x3dc   :  { %s621_s26 = scalar_lea.hbm %s747_s5, 32 }
 0x3dd   :  { %p622_p13 = scmp.ne.s32.totalorder %s747_s5, %s621_s26  ;;  %p625_p0 = scmp.lt.u32.totalorder %s621_s26, %s747_s5 }
 0x3df   :  { %p627_p1 = pnand %p625_p0, %p622_p13 }
 0x3e1   :  { %630 = shalt.err (!%p627_p1)
}
 0x3e2   :  { %498 = dma.vmem_to_hbm [thread:$0]  %s496_s23, 32, %s747_s5, [#allocation3]  }
 0x3e3   :  { %631 = dma.done.wait [#allocation3], 32  }
 0x3e4   :  { %632 = vsyncadd [#allocation3], 4294967264 }
 0x3e5   :  { %633 = dma.done.wait [#allocation5], 32  }
 0x3e6   :  { %634 = vsyncadd [#allocation5], 4294967264 }
 0x3e7   :  { %515 = vsyncpa [#allocation3], 1 }
 0x3e8   :  { %516 = vsyncpa [#allocation5], 1 }

</bundles_post_ra>
